<compile_context>
chip_gen: v7x
topology: tpu7x:2x2x1
jax: 0.10.0
libtpu: 0.0.40
codegen_flags: <defaults>
</compile_context>

<pallas_src>
import functools

import jax
import jax.numpy as jnp
from jax.experimental import pallas as pl
from jax.experimental.pallas import tpu as pltpu


_NEG_BIG = -1.0e30  # bias for padded gene columns -> exactly 0 softmax weight


def _round_up(x, m):
    return (x + m - 1) // m * m


def _decoder_kernel(z_ref, lib_ref, rb_ref, w1_ref, ws_ref, bs_ref, wa_ref, ba_ref,
                    *rest, with_r, block_g, use_stash):
    n_out = 4 if with_r else 3
    scale_ref, rate_ref, drop_ref = rest[0], rest[1], rest[2]
    r_ref = rest[3] if with_r else None
    scratch = rest[n_out:]
    if use_stash:
        h_scr, m_scr, l_scr, el_scr, lg_scr = scratch
    else:
        h_scr, m_scr, l_scr, el_scr = scratch
        lg_scr = None

    p = pl.program_id(1)   # 0: softmax-statistics sweep, 1: output sweep
    g = pl.program_id(2)   # gene tile

    # ---- hidden layer: once per batch tile (covariate one-hot folded into rb) ----
    @pl.when(jnp.logical_and(p == 0, g == 0))
    def _():
        zt = z_ref[...].astype(w1_ref.dtype)
        h = jnp.dot(zt, w1_ref[...], preferred_element_type=jnp.float32) + rb_ref[...]
        h_scr[...] = jnp.maximum(h, 0.0).astype(h_scr.dtype)
        m_scr[...] = jnp.full(m_scr.shape, -jnp.inf, dtype=m_scr.dtype)
        l_scr[...] = jnp.zeros(l_scr.shape, dtype=l_scr.dtype)
        el_scr[...] = jnp.exp(lib_ref[...])

    h = h_scr[...]

    # ---- pass 0: compute logits once, stash them, online softmax statistics ----
    @pl.when(p == 0)
    def _():
        logits = jnp.dot(h, ws_ref[...], preferred_element_type=jnp.float32) + bs_ref[...]
        if use_stash:
            lq = logits.astype(lg_scr.dtype)
            lg_scr[g] = lq
            # statistics from the stashed (possibly bf16-rounded) values so the
            # normalized softmax stays exactly self-consistent with pass 1.
            logits = lq.astype(jnp.float32)
        m_prev = m_scr[...]
        m_new = jnp.maximum(m_prev, jnp.max(logits, axis=-1, keepdims=True))
        l_scr[...] = (l_scr[...] * jnp.exp(m_prev - m_new)
                      + jnp.sum(jnp.exp(logits - m_new), axis=-1, keepdims=True))
        m_scr[...] = m_new

    # ---- pass 1: normalize + write all heads for this gene tile ----
    @pl.when(p == 1)
    def _():
        if use_stash:
            logits = lg_scr[g].astype(jnp.float32)
        else:
            logits = jnp.dot(h, ws_ref[...], preferred_element_type=jnp.float32) + bs_ref[...]
        inv_l = 1.0 / l_scr[...]          # exact divide: px_scale rows sum to 1
        scale = jnp.exp(logits - m_scr[...]) * inv_l
        scale_ref[...] = scale.astype(scale_ref.dtype)
        rate_ref[...] = (el_scr[...] * scale).astype(rate_ref.dtype)
        # fused [Wr | Wd] (or just Wd) projection: one MXU pass for the aux heads
        aux = jnp.dot(h, wa_ref[...], preferred_element_type=jnp.float32) + ba_ref[...]
        if with_r:
            r_ref[...] = aux[:, :block_g].astype(r_ref.dtype)
            drop_ref[...] = aux[:, block_g:].astype(drop_ref.dtype)
        else:
            drop_ref[...] = aux.astype(drop_ref.dtype)


def decoder_scvi_pallas(params, dispersion, z, library, cat, n_cat, *,
                        block_b=256, block_g=1024,
                        matmul_dtype=jnp.bfloat16, out_dtype=jnp.float32,
                        stash_logits=None, stash_budget_bytes=24 * 1024 * 1024,
                        min_batch_tiles=1):
    """DecoderSCVI forward with a Pallas TPU kernel.

    z: (B, n_input) f32, library: (B, 1) f32, cat: (B,) int32.
    Returns (px_scale, px_r, px_rate, px_dropout); px_r is None unless 'gene-cell'.

    Knobs:
      matmul_dtype     bf16 (default) halves weight DMA; f32 for exact matching.
      out_dtype        bf16 halves output writeback (semantics-affecting; default f32).
      stash_logits     None=auto (stash when it fits stash_budget_bytes), True/False force.
      min_batch_tiles  set 2 on v7x so the parallel batch axis feeds both TensorCores.
    """
    f32 = jnp.float32
    B, Dz = z.shape
    H = params["w1"].shape[1]
    G = params["ws"].shape[1]
    with_r = dispersion == "gene-cell"
    n_aux = 2 if with_r else 1
    n_out = 4 if with_r else 3

    # ---- tile sizes (sublane/lane aligned) and padded extents ----
    Bp8 = _round_up(B, 8)
    block_b = min(_round_up(max(int(block_b), 8), 8), Bp8)
    if min_batch_tiles > 1 and Bp8 >= 8 * min_batch_tiles:
        # v7x megacore: guarantee >= min_batch_tiles tiles on the "parallel" axis
        block_b = min(block_b, _round_up(-(-Bp8 // min_batch_tiles), 8))
    Bp = _round_up(B, block_b)
    nb = Bp // block_b

    block_g = min(_round_up(max(int(block_g), 128), 128), _round_up(G, 128))
    Gp = _round_up(G, block_g)
    ng = Gp // block_g

    # ---- logits-stash policy (pass 0 computes & stores, pass 1 only normalizes) ----
    mm_itemsize = jnp.dtype(matmul_dtype).itemsize
    out_itemsize = jnp.dtype(out_dtype).itemsize
    stash_f32_bytes = block_b * Gp * 4
    stash_bf16_bytes = block_b * Gp * 2
    if stash_logits is None:
        use_stash = stash_bf16_bytes <= stash_budget_bytes
    else:
        use_stash = bool(stash_logits)
    stash_dtype = f32 if stash_f32_bytes <= stash_budget_bytes else jnp.bfloat16

    # ---- first layer: split covariate columns of W1; one-hot matmul -> gather ----
    w1 = params["w1"].astype(f32)
    b1 = params["b1"].astype(f32)
    w1_z = w1[:Dz].astype(matmul_dtype)                 # (Dz, H)
    w1_cat = w1[Dz:]                                    # (n_cat, H)
    row_bias = b1 + jnp.take(w1_cat, cat, axis=0)       # (B, H) == b1 + one_hot(cat) @ W1_cat

    # ---- batch padding ----
    db = Bp - B
    z_p = jnp.pad(z.astype(f32), ((0, db), (0, 0)))
    lib_p = jnp.pad(library.astype(f32), ((0, db), (0, 0)))
    rb_p = jnp.pad(row_bias, ((0, db), (0, 0)))

    # ---- gene padding + aux-head fusion (per-tile interleave [Wr tile | Wd tile]) ----
    dg = Gp - G
    ws_p = jnp.pad(params["ws"].astype(f32), ((0, 0), (0, dg))).astype(matmul_dtype)
    # bs stays f32: -1e30 padding must not be narrowed (keeps exp underflow -> exact 0)
    bs_p = jnp.pad(params["bs"].astype(f32), ((0, 0), (0, dg)), constant_values=_NEG_BIG)
    wd_p = jnp.pad(params["wd"].astype(f32), ((0, 0), (0, dg)))
    bd_p = jnp.pad(params["bd"].astype(f32), ((0, 0), (0, dg)))
    if with_r:
        wr_p = jnp.pad(params["wr"].astype(f32), ((0, 0), (0, dg)))
        br_p = jnp.pad(params["br"].astype(f32), ((0, 0), (0, dg)))
        wa = jnp.stack([wr_p.reshape(H, ng, block_g),
                        wd_p.reshape(H, ng, block_g)], axis=2).reshape(H, ng * 2 * block_g)
        ba = jnp.stack([br_p.reshape(1, ng, block_g),
                        bd_p.reshape(1, ng, block_g)], axis=2).reshape(1, ng * 2 * block_g)
    else:
        wa, ba = wd_p, bd_p
    wa = wa.astype(matmul_dtype)

    # ---- BlockSpecs ----
    def bmap(b, p, g):          # batch-tile inputs
        return (b, 0)

    def wmap(b, p, g):          # resident first-layer weight (constant index)
        return (0, 0)

    if use_stash:
        def gmap_ws(b, p, g):   # Ws / bs only streamed during the statistics pass
            return (0, g * (1 - p))
    else:
        def gmap_ws(b, p, g):   # recompute path: streamed in both passes
            return (0, g)

    def gmap_pass1(b, p, g):    # aux weights only needed on the output pass
        return (0, g * p)

    def omap(b, p, g):          # outputs: parked on tile 0 during the stats pass
        return (b, g * p)

    in_specs = [
        pl.BlockSpec((block_b, Dz), bmap),                 # z
        pl.BlockSpec((block_b, 1), bmap),                  # library
        pl.BlockSpec((block_b, H), bmap),                  # per-row bias b1 + W1_cat[cat]
        pl.BlockSpec((Dz, H), wmap),                       # W1_z
        pl.BlockSpec((H, block_g), gmap_ws),               # Ws tile
        pl.BlockSpec((1, block_g), gmap_ws),               # bs tile (f32)
        pl.BlockSpec((H, n_aux * block_g), gmap_pass1),    # fused [Wr|Wd] (or Wd) tile
        pl.BlockSpec((1, n_aux * block_g), gmap_pass1),    # fused bias tile (f32)
    ]
    out_specs = [pl.BlockSpec((block_b, block_g), omap) for _ in range(n_out)]
    out_shape = [jax.ShapeDtypeStruct((Bp, Gp), out_dtype) for _ in range(n_out)]

    scratch_shapes = [
        pltpu.VMEM((block_b, H), matmul_dtype),   # hidden activations
        pltpu.VMEM((block_b, 1), f32),            # running max
        pltpu.VMEM((block_b, 1), f32),            # running sum
        pltpu.VMEM((block_b, 1), f32),            # exp(library)
    ]
    if use_stash:
        scratch_shapes.append(pltpu.VMEM((ng, block_b, block_g), stash_dtype))

    # ---- computed VMEM budget: double-buffered tiles + outputs + scratch + headroom ----
    stash_bytes = (block_b * Gp * jnp.dtype(stash_dtype).itemsize) if use_stash else 0
    in_bytes = 2 * (block_b * Dz * 4 + block_b * 4 + block_b * H * 4
                    + Dz * H * mm_itemsize
                    + H * block_g * mm_itemsize + block_g * 4
                    + H * n_aux * block_g * mm_itemsize + n_aux * block_g * 4)
    out_bytes = 2 * n_out * block_b * block_g * out_itemsize
    scratch_bytes = block_b * H * mm_itemsize + 3 * block_b * 4 + stash_bytes
    need = in_bytes + out_bytes + scratch_bytes + (8 << 20)     # + headroom
    try:
        phys = int(pltpu.get_tpu_info().vmem_capacity_bytes)
    except Exception:
        phys = 64 << 20                                          # v7x-safe fallback
    vmem_limit = int(min(max(need, 32 << 20), max(phys - (4 << 20), 32 << 20)))

    kernel = functools.partial(_decoder_kernel, with_r=with_r, block_g=block_g,
                               use_stash=use_stash)

    fn = pl.pallas_call(
        kernel,
        grid=(nb, 2, ng),
        in_specs=in_specs,
        out_specs=out_specs,
        out_shape=out_shape,
        scratch_shapes=scratch_shapes,
        compiler_params=pltpu.CompilerParams(
            dimension_semantics=("parallel", "arbitrary", "arbitrary"),
            vmem_limit_bytes=vmem_limit,
        ),
    )

    outs = fn(z_p, lib_p, rb_p, w1_z, ws_p, bs_p, wa, ba)
    scale_p, rate_p, drop_p = outs[:3]
    r_p = outs[3] if with_r else None

    px_scale = scale_p[:B, :G]
    px_rate = rate_p[:B, :G]
    px_dropout = drop_p[:B, :G]
    px_r = r_p[:B, :G] if with_r else None
    return px_scale, px_r, px_rate, px_dropout


def decoder_scvi_ref(params, dispersion, z, library, cat, n_cat):
    """Pure-JAX reference (mirrors the PyTorch forward exactly)."""
    one_hot = jax.nn.one_hot(cat, n_cat, dtype=z.dtype)
    x = jnp.concatenate([z, one_hot], axis=-1)
    h = jax.nn.relu(x @ params["w1"] + params["b1"])
    px_scale = jax.nn.softmax(h @ params["ws"] + params["bs"], axis=-1)
    px_r = h @ params["wr"] + params["br"] if dispersion == "gene-cell" else None
    px_dropout = h @ params["wd"] + params["bd"]
    px_rate = jnp.exp(library) * px_scale
    return px_scale, px_r, px_rate, px_dropout


def init_params(key, n_input, n_output, n_hidden, n_cat):
    """Deterministic init mimicking torch.nn.Linear (uniform +/- 1/sqrt(fan_in))."""
    d_in0 = n_input + n_cat
    ks = jax.random.split(key, 8)

    def lin(kw, kb, fan_in, fan_out):
        bound = 1.0 / jnp.sqrt(float(fan_in))
        w = jax.random.uniform(kw, (fan_in, fan_out), jnp.float32, -bound, bound)
        b = jax.random.uniform(kb, (1, fan_out), jnp.float32, -bound, bound)
        return w, b

    w1, b1 = lin(ks[0], ks[1], d_in0, n_hidden)
    ws, bs = lin(ks[2], ks[3], n_hidden, n_output)
    wr, br = lin(ks[4], ks[5], n_hidden, n_output)
    wd, bd = lin(ks[6], ks[7], n_hidden, n_output)
    return {"w1": w1, "b1": b1, "ws": ws, "bs": bs,
            "wr": wr, "br": br, "wd": wd, "bd": bd}


def _assert_close(name, a, b, rtol, atol):
    assert a.shape == b.shape, (name, a.shape, b.shape)
    a = a.astype(jnp.float32)
    ok = bool(jnp.allclose(a, b, rtol=rtol, atol=atol))
    assert ok, (name, float(jnp.max(jnp.abs(a - b))))


if __name__ == "__main__":
    # DecoderSCVI-consistent small shapes: latent=16, genes=256, hidden=128, one cat (3)
    B, n_input, n_output, n_hidden, n_cat = 8, 16, 256, 128, 3

    key = jax.random.PRNGKey(0)
    kp, kz, kl, kc = jax.random.split(key, 4)
    params = init_params(kp, n_input, n_output, n_hidden, n_cat)
    z = jax.random.normal(kz, (B, n_input), jnp.float32)
    library = jax.random.normal(kl, (B, 1), jnp.float32)
    cat = jax.random.randint(kc, (B,), 0, n_cat, jnp.int32)

    ref = decoder_scvi_ref(params, "gene-cell", z, library, cat, n_cat)

    # --- 1. default path: bf16 weights/hidden + logits stash, gene-cell dispersion ---
    out = jax.block_until_ready(
        decoder_scvi_pallas(params, "gene-cell", z, library, cat, n_cat))
    for name, a, b in zip(["px_scale", "px_r", "px_rate", "px_dropout"], out, ref):
        _assert_close(name, a, b, rtol=5e-2, atol=2e-2)
    assert jnp.allclose(jnp.sum(out[0], axis=-1), 1.0, atol=1e-2)

    # --- 2. f32 MXU path: tight check; 'gene' dispersion skips the r head entirely ---
    out_f = jax.block_until_ready(
        decoder_scvi_pallas(params, "gene-cell", z, library, cat, n_cat,
                            matmul_dtype=jnp.float32))
    for name, a, b in zip(["f32/px_scale", "f32/px_r", "f32/px_rate",
                           "f32/px_dropout"], out_f, ref):
        _assert_close(name, a, b, rtol=1e-3, atol=1e-4)
    assert jnp.allclose(jnp.sum(out_f[0], axis=-1), 1.0, atol=1e-3)

    out_g = jax.block_until_ready(
        decoder_scvi_pallas(params, "gene", z, library, cat, n_cat,
                            matmul_dtype=jnp.float32))
    ref_g = decoder_scvi_ref(params, "gene", z, library, cat, n_cat)
    assert out_g[1] is None and ref_g[1] is None
    _assert_close("gene/px_scale", out_g[0], ref_g[0], rtol=1e-3, atol=1e-4)
    _assert_close("gene/px_rate", out_g[2], ref_g[2], rtol=1e-3, atol=1e-4)
    _assert_close("gene/px_dropout", out_g[3], ref_g[3], rtol=1e-3, atol=1e-4)

    # --- 3. ragged shapes: batch & gene padding + multi-tile online softmax;
    #        exercise f32-stash, forced-recompute and bf16-stash paths ---
    B2, G2 = 12, 200
    params2 = init_params(jax.random.PRNGKey(1), n_input, G2, n_hidden, n_cat)
    z2 = jax.random.normal(jax.random.PRNGKey(2), (B2, n_input), jnp.float32)
    lib2 = jax.random.normal(jax.random.PRNGKey(3), (B2, 1), jnp.float32)
    cat2 = jax.random.randint(jax.random.PRNGKey(4), (B2,), 0, n_cat, jnp.int32)
    ref2 = decoder_scvi_ref(params2, "gene-cell", z2, lib2, cat2, n_cat)

    for tag, kwargs in [
        ("stash_f32", dict()),                              # auto -> f32 logits stash
        ("recompute", dict(stash_logits=False)),            # Ws recompute fallback
        ("stash_bf16", dict(stash_budget_bytes=6 * 1024)),  # forces the bf16 stash path
    ]:
        out2 = jax.block_until_ready(
            decoder_scvi_pallas(params2, "gene-cell", z2, lib2, cat2, n_cat,
                                block_b=8, block_g=128, matmul_dtype=jnp.float32,
                                **kwargs))
        for name, a, b in zip(["px_scale", "px_r", "px_rate", "px_dropout"],
                              out2, ref2):
            _assert_close(f"{tag}/{name}", a, b, rtol=2e-2, atol=1e-3)

    # --- 4. v7x-style knobs: two batch tiles for megacore + bf16 outputs ---
    out3 = jax.block_until_ready(
        decoder_scvi_pallas(params2, "gene-cell", z2, lib2, cat2, n_cat,
                            block_b=256, block_g=128, min_batch_tiles=2,
                            out_dtype=jnp.bfloat16))
    for name, a, b in zip(["px_scale", "px_r", "px_rate", "px_dropout"], out3, ref2):
        _assert_close("v7x/" + name, a, b, rtol=5e-2, atol=2e-2)

    print("KERNEL_OK")
</pallas_src>

<mosaic_0001>
module attributes {stable_mosaic.version = 11 : i64} {
  func.func @_decoder_kernel(%arg0: i32, %arg1: i32, %arg2: i32, %arg3: memref<8x16xf32, #tpu.memory_space<vmem>>, %arg4: memref<8x1xf32, #tpu.memory_space<vmem>>, %arg5: memref<8x128xf32, #tpu.memory_space<vmem>>, %arg6: memref<16x128xbf16, #tpu.memory_space<vmem>>, %arg7: memref<128x256xbf16, #tpu.memory_space<vmem>>, %arg8: memref<1x256xf32, #tpu.memory_space<vmem>>, %arg9: memref<128x512xbf16, #tpu.memory_space<vmem>>, %arg10: memref<1x512xf32, #tpu.memory_space<vmem>>, %arg11: memref<8x256xf32, #tpu.memory_space<vmem>>, %arg12: memref<8x256xf32, #tpu.memory_space<vmem>>, %arg13: memref<8x256xf32, #tpu.memory_space<vmem>>, %arg14: memref<8x256xf32, #tpu.memory_space<vmem>>, %arg15: memref<8x128xbf16, #tpu.memory_space<vmem>>, %arg16: memref<8x1xf32, #tpu.memory_space<vmem>>, %arg17: memref<8x1xf32, #tpu.memory_space<vmem>>, %arg18: memref<8x1xf32, #tpu.memory_space<vmem>>, %arg19: memref<1x8x256xf32, #tpu.memory_space<vmem>>) attributes {dimension_semantics = [#tpu.dimension_semantics<parallel>, #tpu.dimension_semantics<arbitrary>, #tpu.dimension_semantics<arbitrary>], iteration_bounds = array<i64: 1, 2, 1>, scalar_prefetch = 0 : i64, scratch_operands = 5 : i64, tpu.core_type = #tpu.core_type<tc>, window_params = [{transform_indices = @transform_0, window_bounds = array<i64: 8, 16>}, {transform_indices = @transform_1, window_bounds = array<i64: 8, 1>}, {transform_indices = @transform_2, window_bounds = array<i64: 8, 128>}, {pipeline_mode = #tpu.pipeline_mode<synchronous>, transform_indices = @transform_3, window_bounds = array<i64: 16, 128>}, {transform_indices = @transform_4, window_bounds = array<i64: 128, 256>}, {transform_indices = @transform_5, window_bounds = array<i64: 1, 256>}, {transform_indices = @transform_6, window_bounds = array<i64: 128, 512>}, {transform_indices = @transform_7, window_bounds = array<i64: 1, 512>}, {transform_indices = @transform_8, window_bounds = array<i64: 8, 256>}, {transform_indices = @transform_9, window_bounds = array<i64: 8, 256>}, {transform_indices = @transform_10, window_bounds = array<i64: 8, 256>}, {transform_indices = @transform_11, window_bounds = array<i64: 8, 256>}]} {
    %c0_i32 = arith.constant 0 : i32
    %0 = arith.cmpi eq, %arg1, %c0_i32 : i32
    %c0_i32_0 = arith.constant 0 : i32
    %1 = arith.cmpi eq, %arg2, %c0_i32_0 : i32
    %2 = arith.andi %0, %1 : i1
    %3 = arith.extui %2 : i1 to i32
    %c0_i32_1 = arith.constant 0 : i32
    %4 = arith.cmpi ne, %3, %c0_i32_1 : i32
    scf.if %4 {
      %c0_6 = arith.constant 0 : index
      %c0_7 = arith.constant 0 : index
      %12 = vector.load %arg3[%c0_6, %c0_7] : memref<8x16xf32, #tpu.memory_space<vmem>>, vector<8x16xf32>
      %13 = arith.truncf %12 : vector<8x16xf32> to vector<8x16xbf16>
      %c0_8 = arith.constant 0 : index
      %c0_9 = arith.constant 0 : index
      %14 = vector.load %arg6[%c0_8, %c0_9] : memref<16x128xbf16, #tpu.memory_space<vmem>>, vector<16x128xbf16>
      %cst = arith.constant dense<0.000000e+00> : vector<8x128xf32>
      %15 = tpu.matmul %13, %14, %cst {dimension_numbers = #tpu.dot_dimension_numbers<[1], [0], [0], [1], [0, 0, 1, 1], [], []>} : vector<8x16xbf16>, vector<16x128xbf16>, vector<8x128xf32> -> vector<8x128xf32>
      %c0_10 = arith.constant 0 : index
      %c0_11 = arith.constant 0 : index
      %16 = vector.load %arg5[%c0_10, %c0_11] : memref<8x128xf32, #tpu.memory_space<vmem>>, vector<8x128xf32>
      %17 = arith.addf %15, %16 : vector<8x128xf32>
      %cst_12 = arith.constant 0.000000e+00 : f32
      %18 = vector.broadcast %cst_12 : f32 to vector<8x128xf32>
      %19 = arith.maximumf %17, %18 : vector<8x128xf32>
      %20 = arith.truncf %19 : vector<8x128xf32> to vector<8x128xbf16>
      %c0_13 = arith.constant 0 : index
      %c0_14 = arith.constant 0 : index
      %21 = vector.load %arg15[%c0_13, %c0_14] : memref<8x128xbf16, #tpu.memory_space<vmem>>, vector<8x128xbf16>
      tpu.vector_store %arg15[%c0_13, %c0_14], %20 {strides = array<i32>} : memref<8x128xbf16, #tpu.memory_space<vmem>>, vector<8x128xbf16>,
      %cst_15 = arith.constant 0xFF800000 : f32
      %22 = vector.broadcast %cst_15 : f32 to vector<8x1xf32>
      %c0_16 = arith.constant 0 : index
      %c0_17 = arith.constant 0 : index
      %23 = vector.load %arg16[%c0_16, %c0_17] : memref<8x1xf32, #tpu.memory_space<vmem>>, vector<8x1xf32>
      tpu.vector_store %arg16[%c0_16, %c0_17], %22 {strides = array<i32>} : memref<8x1xf32, #tpu.memory_space<vmem>>, vector<8x1xf32>,
      %cst_18 = arith.constant 0.000000e+00 : f32
      %24 = vector.broadcast %cst_18 : f32 to vector<8x1xf32>
      %c0_19 = arith.constant 0 : index
      %c0_20 = arith.constant 0 : index
      %25 = vector.load %arg17[%c0_19, %c0_20] : memref<8x1xf32, #tpu.memory_space<vmem>>, vector<8x1xf32>
      tpu.vector_store %arg17[%c0_19, %c0_20], %24 {strides = array<i32>} : memref<8x1xf32, #tpu.memory_space<vmem>>, vector<8x1xf32>,
      %c0_21 = arith.constant 0 : index
      %c0_22 = arith.constant 0 : index
      %26 = vector.load %arg4[%c0_21, %c0_22] : memref<8x1xf32, #tpu.memory_space<vmem>>, vector<8x1xf32>
      %27 = math.exp %26 : vector<8x1xf32>
      %c0_23 = arith.constant 0 : index
      %c0_24 = arith.constant 0 : index
      %28 = vector.load %arg18[%c0_23, %c0_24] : memref<8x1xf32, #tpu.memory_space<vmem>>, vector<8x1xf32>
      tpu.vector_store %arg18[%c0_23, %c0_24], %27 {strides = array<i32>} : memref<8x1xf32, #tpu.memory_space<vmem>>, vector<8x1xf32>,
    } else {
    }
    %c0 = arith.constant 0 : index
    %c0_2 = arith.constant 0 : index
    %5 = vector.load %arg15[%c0, %c0_2] : memref<8x128xbf16, #tpu.memory_space<vmem>>, vector<8x128xbf16>
    %c0_i32_3 = arith.constant 0 : i32
    %6 = arith.cmpi eq, %arg1, %c0_i32_3 : i32
    %7 = arith.extui %6 : i1 to i32
    %c0_i32_4 = arith.constant 0 : i32
    %8 = arith.cmpi ne, %7, %c0_i32_4 : i32
    scf.if %8 {
      %c0_6 = arith.constant 0 : index
      %c0_7 = arith.constant 0 : index
      %12 = vector.load %arg7[%c0_6, %c0_7] : memref<128x256xbf16, #tpu.memory_space<vmem>>, vector<128x256xbf16>
      %cst = arith.constant dense<0.000000e+00> : vector<8x256xf32>
      %13 = tpu.matmul %5, %12, %cst {dimension_numbers = #tpu.dot_dimension_numbers<[1], [0], [0], [1], [0, 0, 1, 1], [], []>} : vector<8x128xbf16>, vector<128x256xbf16>, vector<8x256xf32> -> vector<8x256xf32>
      %c0_8 = arith.constant 0 : index
      %c0_9 = arith.constant 0 : index
      %14 = vector.load %arg8[%c0_8, %c0_9] : memref<1x256xf32, #tpu.memory_space<vmem>>, vector<1x256xf32>
      %15 = vector.broadcast %14 : vector<1x256xf32> to vector<8x256xf32>
      %16 = arith.addf %13, %15 : vector<8x256xf32>
      %17 = arith.index_cast %arg2 : i32 to index
      %c0_10 = arith.constant 0 : index
      %c0_11 = arith.constant 0 : index
      %18 = vector.load %arg19[%17, %c0_10, %c0_11] : memref<1x8x256xf32, #tpu.memory_space<vmem>>, vector<1x8x256xf32>
      %19 = vector.shape_cast %18 : vector<1x8x256xf32> to vector<8x256xf32>
      %20 = vector.shape_cast %16 : vector<8x256xf32> to vector<1x8x256xf32>
      tpu.vector_store %arg19[%17, %c0_10, %c0_11], %20 {strides = array<i32>} : memref<1x8x256xf32, #tpu.memory_space<vmem>>, vector<1x8x256xf32>,
      %c0_12 = arith.constant 0 : index
      %c0_13 = arith.constant 0 : index
      %21 = vector.load %arg16[%c0_12, %c0_13] : memref<8x1xf32, #tpu.memory_space<vmem>>, vector<8x1xf32>
      %cst_14 = arith.constant dense<0xFF800000> : vector<8xf32>
      %22 = vector.multi_reduction <maximumf>, %16, %cst_14 [1] : vector<8x256xf32> to vector<8xf32>
      %23 = vector.shape_cast %22 : vector<8xf32> to vector<8x1xf32>
      %24 = arith.maximumf %21, %23 : vector<8x1xf32>
      %c0_15 = arith.constant 0 : index
      %c0_16 = arith.constant 0 : index
      %25 = vector.load %arg17[%c0_15, %c0_16] : memref<8x1xf32, #tpu.memory_space<vmem>>, vector<8x1xf32>
      %26 = arith.subf %21, %24 : vector<8x1xf32>
      %27 = math.exp %26 : vector<8x1xf32>
      %28 = arith.mulf %25, %27 : vector<8x1xf32>
      %29 = vector.broadcast %24 : vector<8x1xf32> to vector<8x256xf32>
      %30 = arith.subf %16, %29 : vector<8x256xf32>
      %31 = math.exp %30 : vector<8x256xf32>
      %cst_17 = arith.constant dense<0.000000e+00> : vector<8xf32>
      %32 = vector.multi_reduction <add>, %31, %cst_17 [1] : vector<8x256xf32> to vector<8xf32>
      %33 = vector.shape_cast %32 : vector<8xf32> to vector<8x1xf32>
      %34 = arith.addf %28, %33 : vector<8x1xf32>
      %c0_18 = arith.constant 0 : index
      %c0_19 = arith.constant 0 : index
      %35 = vector.load %arg17[%c0_18, %c0_19] : memref<8x1xf32, #tpu.memory_space<vmem>>, vector<8x1xf32>
      tpu.vector_store %arg17[%c0_18, %c0_19], %34 {strides = array<i32>} : memref<8x1xf32, #tpu.memory_space<vmem>>, vector<8x1xf32>,
      %c0_20 = arith.constant 0 : index
      %c0_21 = arith.constant 0 : index
      %36 = vector.load %arg16[%c0_20, %c0_21] : memref<8x1xf32, #tpu.memory_space<vmem>>, vector<8x1xf32>
      tpu.vector_store %arg16[%c0_20, %c0_21], %24 {strides = array<i32>} : memref<8x1xf32, #tpu.memory_space<vmem>>, vector<8x1xf32>,
    } else {
    }
    %c1_i32 = arith.constant 1 : i32
    %9 = arith.cmpi eq, %arg1, %c1_i32 : i32
    %10 = arith.extui %9 : i1 to i32
    %c0_i32_5 = arith.constant 0 : i32
    %11 = arith.cmpi ne, %10, %c0_i32_5 : i32
    scf.if %11 {
      %12 = arith.index_cast %arg2 : i32 to index
      %c0_6 = arith.constant 0 : index
      %c0_7 = arith.constant 0 : index
      %13 = vector.load %arg19[%12, %c0_6, %c0_7] : memref<1x8x256xf32, #tpu.memory_space<vmem>>, vector<1x8x256xf32>
      %14 = vector.shape_cast %13 : vector<1x8x256xf32> to vector<8x256xf32>
      %c0_8 = arith.constant 0 : index
      %c0_9 = arith.constant 0 : index
      %15 = vector.load %arg17[%c0_8, %c0_9] : memref<8x1xf32, #tpu.memory_space<vmem>>, vector<8x1xf32>
      %cst = arith.constant 1.000000e+00 : f32
      %16 = vector.broadcast %cst : f32 to vector<8x1xf32>
      %17 = arith.divf %16, %15 : vector<8x1xf32>
      %c0_10 = arith.constant 0 : index
      %c0_11 = arith.constant 0 : index
      %18 = vector.load %arg16[%c0_10, %c0_11] : memref<8x1xf32, #tpu.memory_space<vmem>>, vector<8x1xf32>
      %19 = vector.broadcast %18 : vector<8x1xf32> to vector<8x256xf32>
      %20 = arith.subf %14, %19 : vector<8x256xf32>
      %21 = math.exp %20 : vector<8x256xf32>
      %22 = vector.broadcast %17 : vector<8x1xf32> to vector<8x256xf32>
      %23 = arith.mulf %21, %22 : vector<8x256xf32>
      %c0_12 = arith.constant 0 : index
      %c0_13 = arith.constant 0 : index
      %24 = vector.load %arg11[%c0_12, %c0_13] : memref<8x256xf32, #tpu.memory_space<vmem>>, vector<8x256xf32>
      tpu.vector_store %arg11[%c0_12, %c0_13], %23 {strides = array<i32>} : memref<8x256xf32, #tpu.memory_space<vmem>>, vector<8x256xf32>,
      %c0_14 = arith.constant 0 : index
      %c0_15 = arith.constant 0 : index
      %25 = vector.load %arg18[%c0_14, %c0_15] : memref<8x1xf32, #tpu.memory_space<vmem>>, vector<8x1xf32>
      %26 = vector.broadcast %25 : vector<8x1xf32> to vector<8x256xf32>
      %27 = arith.mulf %26, %23 : vector<8x256xf32>
      %c0_16 = arith.constant 0 : index
      %c0_17 = arith.constant 0 : index
      %28 = vector.load %arg12[%c0_16, %c0_17] : memref<8x256xf32, #tpu.memory_space<vmem>>, vector<8x256xf32>
      tpu.vector_store %arg12[%c0_16, %c0_17], %27 {strides = array<i32>} : memref<8x256xf32, #tpu.memory_space<vmem>>, vector<8x256xf32>,
      %c0_18 = arith.constant 0 : index
      %c0_19 = arith.constant 0 : index
      %29 = vector.load %arg9[%c0_18, %c0_19] : memref<128x512xbf16, #tpu.memory_space<vmem>>, vector<128x512xbf16>
      %cst_20 = arith.constant dense<0.000000e+00> : vector<8x512xf32>
      %30 = tpu.matmul %5, %29, %cst_20 {dimension_numbers = #tpu.dot_dimension_numbers<[1], [0], [0], [1], [0, 0, 1, 1], [], []>} : vector<8x128xbf16>, vector<128x512xbf16>, vector<8x512xf32> -> vector<8x512xf32>
      %c0_21 = arith.constant 0 : index
      %c0_22 = arith.constant 0 : index
      %31 = vector.load %arg10[%c0_21, %c0_22] : memref<1x512xf32, #tpu.memory_space<vmem>>, vector<1x512xf32>
      %32 = vector.broadcast %31 : vector<1x512xf32> to vector<8x512xf32>
      %33 = arith.addf %30, %32 : vector<8x512xf32>
      %34 = vector.extract_strided_slice %33 {offsets = [0, 0], sizes = [8, 256], strides = [1, 1]} : vector<8x512xf32> to vector<8x256xf32>
      %c0_23 = arith.constant 0 : index
      %c0_24 = arith.constant 0 : index
      %35 = vector.load %arg14[%c0_23, %c0_24] : memref<8x256xf32, #tpu.memory_space<vmem>>, vector<8x256xf32>
      tpu.vector_store %arg14[%c0_23, %c0_24], %34 {strides = array<i32>} : memref<8x256xf32, #tpu.memory_space<vmem>>, vector<8x256xf32>,
      %36 = vector.extract_strided_slice %33 {offsets = [0, 256], sizes = [8, 256], strides = [1, 1]} : vector<8x512xf32> to vector<8x256xf32>
      %c0_25 = arith.constant 0 : index
      %c0_26 = arith.constant 0 : index
      %37 = vector.load %arg13[%c0_25, %c0_26] : memref<8x256xf32, #tpu.memory_space<vmem>>, vector<8x256xf32>
      tpu.vector_store %arg13[%c0_25, %c0_26], %36 {strides = array<i32>} : memref<8x256xf32, #tpu.memory_space<vmem>>, vector<8x256xf32>,
    } else {
    }
    return
  }
  func.func @transform_0(%arg0: i32, %arg1: i32, %arg2: i32) -> (i32, i32) {
    %c0_i32 = arith.constant 0 : i32
    %c0_i32_0 = arith.constant 0 : i32
    return %arg0, %c0_i32 : i32, i32
  }
  func.func @transform_1(%arg0: i32, %arg1: i32, %arg2: i32) -> (i32, i32) {
    %c0_i32 = arith.constant 0 : i32
    %c0_i32_0 = arith.constant 0 : i32
    return %arg0, %c0_i32 : i32, i32
  }
  func.func @transform_2(%arg0: i32, %arg1: i32, %arg2: i32) -> (i32, i32) {
    %c0_i32 = arith.constant 0 : i32
    %c0_i32_0 = arith.constant 0 : i32
    return %arg0, %c0_i32 : i32, i32
  }
  func.func @transform_3(%arg0: i32, %arg1: i32, %arg2: i32) -> (i32, i32) {
    %c0_i32 = arith.constant 0 : i32
    %c0_i32_0 = arith.constant 0 : i32
    %c0_i32_1 = arith.constant 0 : i32
    return %c0_i32, %c0_i32_0 : i32, i32
  }
  func.func @transform_4(%arg0: i32, %arg1: i32, %arg2: i32) -> (i32, i32) {
    %c1_i32 = arith.constant 1 : i32
    %0 = arith.subi %c1_i32, %arg1 : i32
    %1 = arith.muli %arg2, %0 : i32
    %c0_i32 = arith.constant 0 : i32
    %c0_i32_0 = arith.constant 0 : i32
    return %c0_i32, %1 : i32, i32
  }
  func.func @transform_5(%arg0: i32, %arg1: i32, %arg2: i32) -> (i32, i32) {
    %c1_i32 = arith.constant 1 : i32
    %0 = arith.subi %c1_i32, %arg1 : i32
    %1 = arith.muli %arg2, %0 : i32
    %c0_i32 = arith.constant 0 : i32
    %c0_i32_0 = arith.constant 0 : i32
    return %c0_i32, %1 : i32, i32
  }
  func.func @transform_6(%arg0: i32, %arg1: i32, %arg2: i32) -> (i32, i32) {
    %0 = arith.muli %arg2, %arg1 : i32
    %c0_i32 = arith.constant 0 : i32
    %c0_i32_0 = arith.constant 0 : i32
    return %c0_i32, %0 : i32, i32
  }
  func.func @transform_7(%arg0: i32, %arg1: i32, %arg2: i32) -> (i32, i32) {
    %0 = arith.muli %arg2, %arg1 : i32
    %c0_i32 = arith.constant 0 : i32
    %c0_i32_0 = arith.constant 0 : i32
    return %c0_i32, %0 : i32, i32
  }
  func.func @transform_8(%arg0: i32, %arg1: i32, %arg2: i32) -> (i32, i32) {
    %0 = arith.muli %arg2, %arg1 : i32
    %c0_i32 = arith.constant 0 : i32
    return %arg0, %0 : i32, i32
  }
  func.func @transform_9(%arg0: i32, %arg1: i32, %arg2: i32) -> (i32, i32) {
    %0 = arith.muli %arg2, %arg1 : i32
    %c0_i32 = arith.constant 0 : i32
    return %arg0, %0 : i32, i32
  }
  func.func @transform_10(%arg0: i32, %arg1: i32, %arg2: i32) -> (i32, i32) {
    %0 = arith.muli %arg2, %arg1 : i32
    %c0_i32 = arith.constant 0 : i32
    return %arg0, %0 : i32, i32
  }
  func.func @transform_11(%arg0: i32, %arg1: i32, %arg2: i32) -> (i32, i32) {
    %0 = arith.muli %arg2, %arg1 : i32
    %c0_i32 = arith.constant 0 : i32
    return %arg0, %0 : i32, i32
  }
}

</mosaic_0001>

<bundles_post_ra>
// kernel: tpu_custom_call.1
= control target key start
LH: loop header
LB: loop body
LE: loop exit
PB: predicated region body
PF: predicated region fallthrough
CT: control target
= control target key end

     0   :  { %s2470_s0 = inlined_call_operand.vmem [shape: f32[8,16], index: 0, kind: input, shape index: {}]   ;;  %s2471_s1 = inlined_call_operand.vmem [shape: f32[8,1], index: 1, kind: input, shape index: {}]   ;;  %s2472_s2 = inlined_call_operand.vmem [shape: f32[8,128], index: 2, kind: input, shape index: {}]   ;;  %s2473_s3 = inlined_call_operand.hbm [shape: bf16[16,128], index: 3, kind: input, shape index: {}]   ;;  %s2474_s4 = inlined_call_operand.hbm [shape: bf16[128,256], index: 4, kind: input, shape index: {}]   ;;  %s2475_s5 = inlined_call_operand.vmem [shape: f32[1,256], index: 5, kind: input, shape index: {}]   ;;  %s2476_s6 = inlined_call_operand.hbm [shape: bf16[128,512], index: 6, kind: input, shape index: {}]   ;;  %s2477_s7 = inlined_call_operand.vmem [shape: f32[1,512], index: 7, kind: input, shape index: {}]   ;;  %s2478_s8 = inlined_call_operand.hbm [shape: f32[8,256], index: 8, kind: output, shape index: {0}]   ;;  %s2479_s9 = inlined_call_operand.hbm [shape: f32[8,256], index: 9, kind: output, shape index: {1}]   ;;  %s2480_s10 = inlined_call_operand.hbm [shape: f32[8,256], index: 10, kind: output, shape index: {2}]   ;;  %s2481_s11 = inlined_call_operand.hbm [shape: f32[8,256], index: 11, kind: output, shape index: {3}]  }
   0x1   :  { %2488 = sst [smem:[#allocation26_spill]] %s2474_s4 }
   0x2   :  { %17 = vsyncpa [#allocation8], 0 }
   0x3   :  { %18 = vsyncpa [#allocation11], 0 }
   0x4   :  { %20 = vsyncpa [#allocation11 + $0x1], 0 }
   0x5   :  { %21 = vsyncpa [#allocation9], 0 }
   0x6   :  { %23 = vsyncpa [#allocation9 + $0x1], 0 }
   0x7   :  { %24 = vsyncpa [#allocation15], 0 }
   0x8   :  { %26 = vsyncpa [#allocation15 + $0x1], 0 }
   0x9   :  { %27 = vsyncpa [#allocation18], 0 }
   0xa   :  { %29 = vsyncpa [#allocation18 + $0x1], 0  ;;  %s2220_s17 = smov 0   ;;  %s2222_s18 = smov 0  }
   0xb   :  { %s2224_s19 = smov 0  }
   0xc LB: > { %2489 = sst [smem:[#allocation24_spill]] %s2136_s18  ;;  %s2142_s20 = smov [#allocation10]   ;;  %s2140_s19 = sphi %s2224_s19, %s35_s19   ;;  %s2136_s18 = sphi %s2222_s18, %s2507_s18   ;;  %s2132_s17 = sphi %s2220_s17, %s2506_s17  }
   0xd   : > { %s454_s21 = sshll.u32 %s2142_s20, 4  ;;  %p1763_p1 = scmp.lt.s32.totalorder %s2140_s19, 2  ;;  %s455_s21 = int_to_ptr.vmem [resolvable:$true] %s454_s21 }
   0xe   : > { %p1764_p2 = scmp.eq.s32.totalorder %s2140_s19, 0  ;;  %s441_s23 = sand.u32 1, %s2140_s19  }
   0xf   : > { %s2244_s25 = scalar_lea.sflag [#allocation11], %s441_s23  ;;  %s2491_s4 = sld [smem:[#allocation26_spill]] }
  0x10   : > { %p2240_p3 = pnand %p1764_p2, %p1763_p1 }
  0x12   : > { %s2490_s24 = scalar_select %p2240_p3, 1, 0 }
  0x13   : > { %p2483_p5 = pneg %p2240_p3 }
  0x15   : > { %s1910_s28 = scalar_lea.hbm %s2491_s4, 2048 }
  0x16   : > { %p1911_p4 = scmp.ne.s32.totalorder %s2491_s4, %s1910_s28  ;;  %p1917_p8 = scmp.lt.u32.totalorder %s1910_s28, %s2491_s4 }
  0x18   : > { %p1913_p6 = pnand %p2483_p5, %p1911_p4 }
  0x1a   : > { %p1914_p7 = pneg %p1913_p6 }
  0x1c   : > { %p1919_p9 = pnand %p1917_p8, %p1914_p7 }
  0x1e   : > { %1922 = shalt.err (!%p1919_p9)
}
  0x1f   : > { %s1923_s14 = scalar_lea.vmem %s455_s21, 2048  ;;  %s1930_s15 = scalar_lea.vmem %s455_s21, 4096 }
  0x20   : > { %p1924_p10 = scmp.ne.s32.totalorder %s455_s21, %s1923_s14  ;;  %p1931_p13 = scmp.lt.s32.totalorder %s455_s21, %s455_s21 }
  0x21   : > { %p1932_p1 = scmp.lt.s32.totalorder %s1930_s15, %s1923_s14 }
  0x22   : > { %p1926_p11 = pnand %p1924_p10, %p2483_p5 }
  0x23   : > { %p1933_p2 = por %p1932_p1, %p1931_p13 }
  0x24   : > { %p1927_p12 = pneg %p1926_p11 }
  0x26   : > { %p1934_p0 = pnand %p1933_p2, %p1927_p12 }
  0x28   : > { %1937 = shalt.err (!%p1934_p0)
}
  0x29   : > { %s2143_s16 = smov 128   ;;  %s2144_s20 = smov 8  }
  0x2a   : > { %1745 = dma.hbm_to_vmem [thread:$0]  (!%p2240_p3), %s2491_s4, 2048, %s455_s21, %s2244_s25, %s2143_s16, %s2143_s16, %s2144_s20  }
  0x2b   : > { %s2270_s27 = sadd.s32 4294967295, %s2140_s19   ;;  %s50_s28 = sadd.s32 1, %s2136_s18 }
  0x2c   : > { %p52_p4 = scmp.ge.s32.totalorder %s50_s28, 2  ;;  %p1624_p0 = scmp.ge.s32.totalorder %s2140_s19, 1 }
  0x2d   : > { %p394_p6 = scmp.lt.s32.totalorder %s2140_s19, 3  ;;  %p2482_p8 = scmp.eq.s32.totalorder %s2270_s27, 0 }
  0x2e   : > { %s2509_s28 = smov (%p52_p4, %s50_s28), 0  ;;  %s2145_s30 = smov [#allocation7]  }
  0x2f   : > { %2492 = sst [smem:[#allocation25_spill]] %s2509_s28  ;;  %p2277_p7 = pnand %p1624_p0, %p394_p6 }
  0x30   : > { %s427_s21 = sshll.u32 %s2145_s30, 4  ;;  %s2146_s13 = smov [#allocation12]   ;;  %s428_s21 = int_to_ptr.vmem [resolvable:$true] %s427_s21 }
  0x31   : > { %s2493_s29 = scalar_select %p2277_p7, 1, 0 }
  0x32   : > { %p1738_p9 = pneg %p2277_p7  ;;  %s488_s14 = sshll.u32 %s2146_s13, 4  ;;  %s2290_s14 = int_to_ptr.vmem [resolvable:$true] %s488_s14 }
  0x33   : > { %s1938_s20 = scalar_lea.hbm %s2473_s3, 128 }
  0x34   : > { %p2286_p10 = pnand %p2482_p8, %p1738_p9  ;;  %p1939_p11 = scmp.ne.s32.totalorder %s2473_s3, %s1938_s20 }
  0x35   : > { %p1945_p2 = scmp.lt.u32.totalorder %s1938_s20, %s2473_s3 }
  0x36   : > { %p1940_p12 = pneg %p2286_p10 }
  0x38   : > { %p1941_p13 = pnand %p1940_p12, %p1939_p11 }
  0x3a   : > { %p1942_p1 = pneg %p1941_p13 }
  0x3c   : > { %p1947_p4 = pnand %p1945_p2, %p1942_p1 }
  0x3e   : > { %1950 = shalt.err (!%p1947_p4)
}
  0x3f   : > { %s1951_s13 = scalar_lea.vmem %s428_s21, 128  ;;  %p1959_p8 = scmp.lt.s32.totalorder %s428_s21, %s428_s21 }
  0x40   : > { %p1952_p0 = scmp.ne.s32.totalorder %s428_s21, %s1951_s13  ;;  %p1960_p5 = scmp.lt.s32.totalorder %s1951_s13, %s1951_s13 }
  0x42   : > { %p1954_p6 = pnand %p1952_p0, %p1940_p12  ;;  %p1961_p7 = por %p1960_p5, %p1959_p8 }
  0x44   : > { %p1955_p9 = pneg %p1954_p6 }
  0x46   : > { %p1962_p3 = pnand %p1961_p7, %p1955_p9 }
  0x48   : > { %1965 = shalt.err (!%p1962_p3)
}
  0x49   : > { %s2147_s15 = smov 64   ;;  %s2148_s16 = smov 4  }
  0x4a   : > { %1741 = dma.hbm_to_vmem [thread:$0]  (!%p2286_p10), %s2473_s3, 128, %s428_s21, [#allocation8], %s2147_s15, %s2147_s15, %s2148_s16  }
  0x4b   : > { %s1966_s30 = scalar_lea.hbm %s2476_s6, 4096  ;;  %p2495_p5 = scmp.ne.s32.totalorder %s2490_s24, 0 }
  0x4c   : > { %p1967_p11 = scmp.ne.s32.totalorder %s2476_s6, %s1966_s30  ;;  %p1973_p12 = scmp.lt.u32.totalorder %s1966_s30, %s2476_s6 }
  0x4d   : > { %p2496_p7 = pneg %p2495_p5 }
  0x4f   : > { %p1969_p3 = pnand %p1967_p11, %p2496_p7 }
  0x51   : > { %p1970_p8 = pneg %p1969_p3 }
  0x53   : > { %p1975_p13 = pnand %p1973_p12, %p1970_p8 }
  0x55   : > { %1978 = shalt.err (!%p1975_p13)
}
  0x56   : > { %s1979_s21 = scalar_lea.vmem %s2290_s14, 4096  ;;  %p2497_p1 = pmov %p2496_p7 }
  0x57   : > { %p1980_p10 = scmp.ne.s32.totalorder %s2290_s14, %s1979_s21  ;;  %s1986_s4 = scalar_lea.vmem %s2290_s14, 8192 }
  0x58   : > { %p1987_p0 = scmp.lt.s32.totalorder %s2290_s14, %s2290_s14  ;;  %p1988_p6 = scmp.lt.s32.totalorder %s1986_s4, %s1979_s21 }
  0x59   : > { %p1982_p2 = pnand %p1980_p10, %p2497_p1 }
  0x5a   : > { %p1989_p9 = por %p1988_p6, %p1987_p0 }
  0x5b   : > { %p1983_p4 = pneg %p1982_p2 }
  0x5d   : > { %p1990_p11 = pnand %p1989_p9, %p1983_p4 }
  0x5f   : > { %1993 = shalt.err (!%p1990_p11)
}
  0x60   : > { %s2149_s18 = smov 256   ;;  %s2150_s28 = smov 16  }
  0x61   : > { %1748 = dma.hbm_to_vmem [thread:$0]  (!%p2495_p5), %s2476_s6, 4096, %s2290_s14, %s2244_s25, %s2149_s18, %s2149_s18, %s2150_s28  }
  0x62   : > { %p2498_p7 = scmp.ne.s32.totalorder %s2493_s29, 0 }
  0x63   : > { %p2499_p3 = scmp.eq.s32.totalorder (!%p2498_p7), %s2270_s27, 0 }
  0x64   : > { %510 = sbr.rel (%p2498_p7) target bundleno = 1364 (0x554), region = 52 }
  0x6b   : > { %2111 = dma.done.wait (%p2499_p3), [#allocation8], 128   ;;  %p2500_p8 = pmov %p2499_p3 }
  0x6c   : > { %s516_s16 = sand.u32 1, %s2270_s27   ;;  %p2501_p12 = pmov %p2499_p3 }
  0x6d   : > { %2113 = vsyncadd (%p2500_p8), [#allocation8], 4294967168  ;;  %s517_s23 = scalar_lea.sflag [#allocation11], %s516_s16 }
  0x6e   : > { %2115 = dma.done.wait (%p2501_p12), %s517_s23, 6144   ;;  %p2502_p13 = pmov %p2499_p3 }
  0x6f   : > { %p653_p5 = scmp.eq.s32.totalorder %s2132_s17, 0 }
  0x70   : > { %2117 = vsyncadd (%p2502_p13), %s517_s23, 4294961152  ;;  %vm717_vm0 = vcmask (%p653_p5), 7168   ;;  %v720_v0 = vld [vmem:[%s2471_s1] sm:$0xff] (%p653_p5)  ;;  %v2151_v1 = vmov (%p653_p5), 0.0   ;;  %v2152_v2 = vmov (%p653_p5), -inf   ;;  %v1820_v4 = vld [vmem:[#allocation7] sm:$0xff] (%p653_p5)  }
  0x71   : > { %658 = sbr.rel (!%p653_p5) target bundleno = 336 (0x150), region = 68  ;;  %1704 = vmatprep.subr.bf16.mxu0 (%p653_p5), %v2151_v1  ;;  %718 = vst.msk [vmem:[#allocation3] sm:$0xff] (%p653_p5), %vm717_vm0, %v2152_v2  ;;  %719 = vst.msk [vmem:[#allocation4] sm:$0xff] (%p653_p5), %vm717_vm0, %v2151_v1  ;;  %v721_v3 = vmul.f32 (%p653_p5), 1.442695, %v720_v0  ;;  %vm2153_vm1 = vmmov (%p653_p5), 0  }
  0x72   : > { %1706 = vmatprep.mubr.msk.bf16.mxu0 (%p653_p5), %vm2153_vm1, %v2151_v1  ;;  %v659_v5 = vld [vmem:[%s2470_s0] sm:$0xff] (%p653_p5)  ;;  %1705 = vmatpush3.bf16.msra.mxu0 (%p653_p5), %v1820_v4  ;;  %vm670_vm2 = vcmask (%p653_p5), 130048  }
  0x73   : > { %1821 = vpow2.f32 (%p653_p5), %v721_v3  ;;  %v660_v6 = vpack.c.bf16 (%p653_p5), %v659_v5, %v659_v5  ;;  %v663_v8 = vld [vmem:[%s2472_s2] sm:$0xff] (%p653_p5) }
  0x75   : > { %1707 = vmatmul.mubr.msk.bf16.vlgmr.msra.gmra.mrb[0].mxu0 (%p653_p5), %vm670_vm2, %v660_v6 }
  0x7d   : > { %v1822_v7 = vpop.eup %1821 }
  0x7e   : > { %723 = vst.msk [vmem:[#allocation5] sm:$0xff] %vm717_vm0, %v1822_v7 }
 0x148   : > { %v708_v9 = vpop.f32.mrb[0].mxu0 }
 0x149   : > { %v709_v10 = vadd.f32 %v708_v9, %v663_v8  ;;  %v1708_v11 = vpop.f32.mrb[1].mxu0 }
 0x14a   : > { %v711_v12 = vpop.f32.mrb[2].mxu0 }
 0x14b   : > { %v714_v13 = vmax.f32 %v709_v10, 0.0  ;;  %v1709_v14 = vpop.f32.mrb[3].mxu0 }
 0x14d   : > { %v715_v15 = vpack.c.bf16 %v714_v13, %v714_v13 }
 0x14f   : > { %716 = vst [vmem:[#allocation2] sm:$0xf] %v715_v15 }
 0x150 PF: > { %p1641_p10 = scmp.ne.s32.totalorder %s2132_s17, 0 }
 0x151   : > { %v1824_v17 = vld [vmem:[#allocation10 + $0x4] ss:$8 sps:$4 sm:$0xff] (!%p1641_p10)   ;;  %v1826_v18 = vld [vmem:[#allocation10] ss:$8 sps:$4 sm:$0xff] (!%p1641_p10)   ;;  %v2154_v19 = vmov (!%p1641_p10), 0   ;;  %v746_v34 = vlaneseq (!%p1641_p10)  ;;  %v882_v48 = vld [vmem:[#allocation3] sm:$0xff] (!%p1641_p10) }
 0x152   : > { %727 = sbr.rel (%p1641_p10) target bundleno = 1023 (0x3ff), region = 72  ;;  %868 = vmatprep.mubr.bf16.mxu0 (!%p1641_p10), %v2154_v19  ;;  %1823 = vset.pattern.permute.xlu0 (!%p1641_p10), %v2154_v19  ;;  %v1827_v20 = vld [vmem:[#allocation10 + $0x14] ss:$8 sps:$4 sm:$0xff] (!%p1641_p10)   ;;  %v1829_v21 = vld [vmem:[#allocation10 + $0x10] ss:$8 sps:$4 sm:$0xff] (!%p1641_p10)   ;;  %vm907_vm3 = vcmask (!%p1641_p10), 7168  }
 0x153   : > { %836 = vmatprep.subr.bf16.mxu0 (!%p1641_p10), %v1824_v17  ;;  %v1830_v22 = vld [vmem:[#allocation10 + $0x24] ss:$8 sps:$4 sm:$0xff] (!%p1641_p10)   ;;  %v1832_v23 = vld [vmem:[#allocation10 + $0x20] ss:$8 sps:$4 sm:$0xff] (!%p1641_p10)   ;;  %v1833_v24 = vld [vmem:[#allocation10 + $0x34] ss:$8 sps:$4 sm:$0xff] (!%p1641_p10)  }
 0x154   : > { %837 = vmatpush1.bf16.msra.mxu0 (!%p1641_p10), %v1826_v18  ;;  %v1835_v25 = vld [vmem:[#allocation10 + $0x30] ss:$8 sps:$4 sm:$0xff] (!%p1641_p10)   ;;  %v1836_v26 = vld [vmem:[#allocation10 + $0x44] ss:$8 sps:$4 sm:$0xff] (!%p1641_p10)   ;;  %v1838_v27 = vld [vmem:[#allocation10 + $0x40] ss:$8 sps:$4 sm:$0xff] (!%p1641_p10)  }
 0x155   : > { %838 = vmatprep.subr.bf16.mxu0 (!%p1641_p10), %v1827_v20  ;;  %v1839_v28 = vld [vmem:[#allocation10 + $0x54] ss:$8 sps:$4 sm:$0xff] (!%p1641_p10)   ;;  %v1841_v29 = vld [vmem:[#allocation10 + $0x50] ss:$8 sps:$4 sm:$0xff] (!%p1641_p10)   ;;  %v1842_v30 = vld [vmem:[#allocation10 + $0x64] ss:$8 sps:$4 sm:$0xff] (!%p1641_p10)  }
 0x156   : > { %v2361_v16 = vld [vmem:[#allocation2] sm:$0xf]  ;;  %v1844_v31 = vld [vmem:[#allocation10 + $0x60] ss:$8 sps:$4 sm:$0xff] (!%p1641_p10)   ;;  %v1845_v32 = vld [vmem:[#allocation10 + $0x74] ss:$8 sps:$4 sm:$0xff] (!%p1641_p10)  }
 0x157   : > { %v1847_v33 = vld [vmem:[#allocation10 + $0x70] ss:$8 sps:$4 sm:$0xff] (!%p1641_p10)   ;;  %v747_v35 = vshrl.u32 (!%p1641_p10), %v746_v34, 7  ;;  %v744_v37 = vld [vmem:[%s2475_s5] sm:$0x3] (!%p1641_p10) }
 0x158   : > { %839 = vmatpush1.bf16.msra.mxu0 (!%p1641_p10), %v1829_v21  ;;  %v887_v62 = vld [vmem:[#allocation4] sm:$0xff] (!%p1641_p10) }
 0x159   : > { %840 = vmatprep.subr.bf16.mxu0 %v1830_v22  ;;  %v748_v36 = vsub.s32 0, %v747_v35  ;;  %v752_v38 = vsub.s32 1, %v747_v35 }
 0x15b   : > { %v749_v39 = vrot.slane %v744_v37, %v748_v36  ;;  %v753_v40 = vrot.slane %v744_v37, %v752_v38 }
 0x15c   : > { %841 = vmatpush1.bf16.msra.mxu0 %v1832_v23 }
 0x15d   : > { %842 = vmatprep.subr.bf16.mxu0 %v1833_v24 }
 0x160   : > { %843 = vmatpush1.bf16.msra.mxu0 %v1835_v25 }
 0x161   : > { %844 = vmatprep.subr.bf16.mxu0 %v1836_v26 }
 0x164   : > { %845 = vmatpush1.bf16.msra.mxu0 %v1838_v27 }
 0x165   : > { %846 = vmatprep.subr.bf16.mxu0 %v1839_v28 }
 0x168   : > { %847 = vmatpush1.bf16.msra.mxu0 %v1841_v29 }
 0x169   : > { %848 = vmatprep.subr.bf16.mxu0 %v1842_v30 }
 0x16c   : > { %849 = vmatpush1.bf16.msra.mxu0 %v1844_v31 }
 0x16d   : > { %850 = vmatprep.subr.bf16.mxu0 %v1845_v32 }
 0x170   : > { %851 = vmatpush1.bf16.msra.mxu0 %v1847_v33 }
 0x173   : > { %869 = vmatmul.mubr.bf16.vlgmr.msra.gmra.mrb[0].mxu0 %v2361_v16 }
 0x246   : > { %v870_v41 = vpop.f32.mrb[0].mxu0 }
 0x247   : > { %v871_v42 = vadd.f32 %v870_v41, %v749_v39  ;;  %v872_v43 = vpop.f32.mrb[1].mxu0 }
 0x248   : > { %v873_v44 = vadd.f32 %v872_v43, %v753_v40  ;;  %v874_v45 = vpop.f32.mrb[2].mxu0 }
 0x249   : > { %880 = vst [vmem:[#allocation6] sm:$0xff] %v871_v42  ;;  %v875_v46 = vpop.f32.mrb[3].mxu0 }
 0x24a   : > { %881 = vst [vmem:[#allocation6 + $0x8] sm:$0xff] %v873_v44  ;;  %v883_v47 = vmax.f32 %v871_v42, %v873_v44 }
 0x24c   : > { %884 = vmax.xlane.f32.xlu0 %v883_v47 }
 0x2d9   : > { %v885_v49 = vpop.xlane.xlu0 %884 }
 0x2da   : > { %v886_v50 = vmax.f32 %v882_v48, %v885_v49 }
 0x2dc   : > { %v888_v51 = vsub.f32 %v882_v48, %v886_v50  ;;  %909 = vst.msk [vmem:[#allocation3] sm:$0xff] %vm907_vm3, %v886_v50  ;;  %894 = vperm.xlu0 %1823, %v886_v50  }
 0x2de   : > { %v889_v60 = vmul.f32 1.442695, %v888_v51 }
 0x35b   : > { %v895_v52 = vpop.permute.xlu0 %894 }
 0x35c   : > { %v897_v53 = vsub.f32 %v871_v42, %v895_v52  ;;  %v898_v54 = vsub.f32 %v873_v44, %v895_v52 }
 0x35e   : > { %v899_v55 = vmul.f32 1.442695, %v897_v53  ;;  %v901_v56 = vmul.f32 1.442695, %v898_v54 }
 0x360   : > { %1848 = vpow2.f32 %v899_v55 }
 0x361   : > { %1850 = vpow2.f32 %v901_v56 }
 0x362   : > { %1852 = vpow2.f32 %v889_v60 }
 0x36a   : > { %v1849_v57 = vpop.eup %1848 }
 0x36b   : > { %v1851_v58 = vpop.eup %1850 }
 0x36c   : > { %v903_v59 = vadd.f32 %v1851_v58, %v1849_v57  ;;  %v1853_v61 = vpop.eup %1852 }
 0x36d   : > { %v891_v63 = vmul.f32 %v1853_v61, %v887_v62 }
 0x36e   : > { %904 = vadd.xlane.f32.xlu1 %v903_v59 }
 0x3fb   : > { %v905_v0 = vpop.xlane.xlu1 %904 }
 0x3fc   : > { %v906_v1 = vadd.f32 %v905_v0, %v891_v63 }
 0x3fe   : > { %908 = vst.msk [vmem:[#allocation4] sm:$0xff] %vm907_vm3, %v906_v1 }
 0x3ff PF: > { %p1658_p1 = scmp.ne.s32.totalorder %s2132_s17, 1 }
 0x400   : > { %v1856_v2 = vld [vmem:[#allocation12 + $0x4] ss:$16 sps:$4 sm:$0xff] (!%p1658_p1)   ;;  %v1858_v3 = vld [vmem:[#allocation12 + $0xc] ss:$16 sps:$4 sm:$0xff] (!%p1658_p1)   ;;  %v2155_v4 = vmov (!%p1658_p1), 0  }
 0x401   : > { %913 = sbr.rel (%p1658_p1) target bundleno = 1275 (0x4fb), region = 76  ;;  %1199 = vmatprep.mubr.bf16.mxu0 (!%p1658_p1), %v2155_v4  ;;  %1240 = vmatprep.mubr.bf16.mxu1 (!%p1658_p1), %v2155_v4  ;;  %v1860_v5 = vld [vmem:[#allocation12] ss:$16 sps:$4 sm:$0xff] (!%p1658_p1)   ;;  %v1861_v6 = vld [vmem:[#allocation12 + $0x8] ss:$16 sps:$4 sm:$0xff] (!%p1658_p1)  }
 0x402   : > { %1167 = vmatprep.subr.bf16.mxu0 (!%p1658_p1), %v1856_v2  ;;  %1854 = vset.pattern.permute.xlu0 (!%p1658_p1), %v2155_v4  ;;  %v1862_v7 = vld [vmem:[#allocation12 + $0x24] ss:$16 sps:$4 sm:$0xff] (!%p1658_p1)   ;;  %v1864_v8 = vld [vmem:[#allocation12 + $0x2c] ss:$16 sps:$4 sm:$0xff] (!%p1658_p1)   ;;  %v1866_v9 = vld [vmem:[#allocation12 + $0x20] ss:$16 sps:$4 sm:$0xff] (!%p1658_p1)  }
 0x403   : > { %1208 = vmatprep.subr.bf16.mxu1 (!%p1658_p1), %v1858_v3  ;;  %1855 = vset.pattern.permute.xlu1 (!%p1658_p1), %v2155_v4  ;;  %v1867_v10 = vld [vmem:[#allocation12 + $0x28] ss:$16 sps:$4 sm:$0xff] (!%p1658_p1)   ;;  %v1868_v11 = vld [vmem:[#allocation12 + $0x44] ss:$16 sps:$4 sm:$0xff] (!%p1658_p1)   ;;  %v1870_v12 = vld [vmem:[#allocation12 + $0x4c] ss:$16 sps:$4 sm:$0xff] (!%p1658_p1)  }
 0x404   : > { %1168 = vmatpush1.bf16.msra.mxu0 (!%p1658_p1), %v1860_v5  ;;  %1209 = vmatpush1.bf16.msra.mxu1 (!%p1658_p1), %v1861_v6  ;;  %v1872_v13 = vld [vmem:[#allocation12 + $0x40] ss:$16 sps:$4 sm:$0xff] (!%p1658_p1)   ;;  %v1873_v14 = vld [vmem:[#allocation12 + $0x48] ss:$16 sps:$4 sm:$0xff] (!%p1658_p1)   ;;  %v1874_v15 = vld [vmem:[#allocation12 + $0x64] ss:$16 sps:$4 sm:$0xff] (!%p1658_p1)  }
 0x405   : > { %1169 = vmatprep.subr.bf16.mxu0 (!%p1658_p1), %v1862_v7  ;;  %1210 = vmatprep.subr.bf16.mxu1 (!%p1658_p1), %v1864_v8  ;;  %v1876_v17 = vld [vmem:[#allocation12 + $0x6c] ss:$16 sps:$4 sm:$0xff] (!%p1658_p1)   ;;  %v1878_v18 = vld [vmem:[#allocation12 + $0x60] ss:$16 sps:$4 sm:$0xff] (!%p1658_p1)   ;;  %v1879_v19 = vld [vmem:[#allocation12 + $0x68] ss:$16 sps:$4 sm:$0xff] (!%p1658_p1)  }
 0x406   : > { %v1880_v20 = vld [vmem:[#allocation12 + $0x84] ss:$16 sps:$4 sm:$0xff] (!%p1658_p1)   ;;  %v1882_v21 = vld [vmem:[#allocation12 + $0x8c] ss:$16 sps:$4 sm:$0xff] (!%p1658_p1)   ;;  %v1884_v22 = vld [vmem:[#allocation12 + $0x80] ss:$16 sps:$4 sm:$0xff] (!%p1658_p1)  }
 0x407   : > { %v1885_v23 = vld [vmem:[#allocation12 + $0x88] ss:$16 sps:$4 sm:$0xff] (!%p1658_p1)   ;;  %v1886_v24 = vld [vmem:[#allocation12 + $0xa4] ss:$16 sps:$4 sm:$0xff] (!%p1658_p1)   ;;  %v1888_v25 = vld [vmem:[#allocation12 + $0xac] ss:$16 sps:$4 sm:$0xff] (!%p1658_p1)  }
 0x408   : > { %1170 = vmatpush1.bf16.msra.mxu0 %v1866_v9  ;;  %1211 = vmatpush1.bf16.msra.mxu1 %v1867_v10  ;;  %v1890_v26 = vld [vmem:[#allocation12 + $0xa0] ss:$16 sps:$4 sm:$0xff]   ;;  %v1891_v27 = vld [vmem:[#allocation12 + $0xa8] ss:$16 sps:$4 sm:$0xff]   ;;  %v1892_v28 = vld [vmem:[#allocation12 + $0xc4] ss:$16 sps:$4 sm:$0xff]  }
 0x409   : > { %1171 = vmatprep.subr.bf16.mxu0 %v1868_v11  ;;  %1212 = vmatprep.subr.bf16.mxu1 %v1870_v12  ;;  %v1894_v29 = vld [vmem:[#allocation12 + $0xcc] ss:$16 sps:$4 sm:$0xff]   ;;  %v922_v30 = vld [vmem:[#allocation3] sm:$0xff]  ;;  %v943_v32 = vld [vmem:[#allocation5] sm:$0xff] }
 0x40a   : > { %v919_v31 = vld [vmem:[#allocation4] sm:$0xff]  ;;  %925 = vperm.xlu0 %1854, %v922_v30   ;;  %946 = vperm.xlu1 %1855, %v943_v32   ;;  %v1896_v33 = vld [vmem:[#allocation12 + $0xc0] ss:$16 sps:$4 sm:$0xff]   ;;  %v1898_v35 = vld [vmem:[#allocation12 + $0xe4] ss:$16 sps:$4 sm:$0xff]  }
 0x40b   : > { %1904 = vrcp.f32 %v919_v31  ;;  %v1897_v34 = vld [vmem:[#allocation12 + $0xc8] ss:$16 sps:$4 sm:$0xff]   ;;  %v1900_v36 = vld [vmem:[#allocation12 + $0xec] ss:$16 sps:$4 sm:$0xff]   ;;  %v1902_v37 = vld [vmem:[#allocation12 + $0xe0] ss:$16 sps:$4 sm:$0xff]  }
 0x40c   : > { %1172 = vmatpush1.bf16.msra.mxu0 %v1872_v13  ;;  %1213 = vmatpush1.bf16.msra.mxu1 %v1873_v14  ;;  %v1903_v38 = vld [vmem:[#allocation12 + $0xe8] ss:$16 sps:$4 sm:$0xff]   ;;  %v918_v41 = vld [vmem:[#allocation6 + $0x8] sm:$0xff]  ;;  %v985_v58 = vld [vmem:[%s2477_s7] sm:$0xf] }
 0x40d   : > { %1173 = vmatprep.subr.bf16.mxu0 %v1874_v15  ;;  %1214 = vmatprep.subr.bf16.mxu1 %v1876_v17  ;;  %v917_v40 = vld [vmem:[#allocation6] sm:$0xff] }
 0x410   : > { %1174 = vmatpush1.bf16.msra.mxu0 %v1878_v18  ;;  %1215 = vmatpush1.bf16.msra.mxu1 %v1879_v19 }
 0x411   : > { %1175 = vmatprep.subr.bf16.mxu0 %v1880_v20  ;;  %1216 = vmatprep.subr.bf16.mxu1 %v1882_v21 }
 0x414   : > { %1176 = vmatpush1.bf16.msra.mxu0 %v1884_v22  ;;  %1217 = vmatpush1.bf16.msra.mxu1 %v1885_v23 }
 0x415   : > { %1177 = vmatprep.subr.bf16.mxu0 %v1886_v24  ;;  %1218 = vmatprep.subr.bf16.mxu1 %v1888_v25  ;;  %v1905_v39 = vpop.eup %1904 }
 0x416   : > { %936 = vperm.xlu0 %1854, %v1905_v39  }
 0x418   : > { %1178 = vmatpush1.bf16.msra.mxu0 %v1890_v26  ;;  %1219 = vmatpush1.bf16.msra.mxu1 %v1891_v27 }
 0x419   : > { %1179 = vmatprep.subr.bf16.mxu0 %v1892_v28  ;;  %1220 = vmatprep.subr.bf16.mxu1 %v1894_v29 }
 0x41c   : > { %1180 = vmatpush1.bf16.msra.mxu0 %v1896_v33  ;;  %1221 = vmatpush1.bf16.msra.mxu1 %v1897_v34 }
 0x41d   : > { %1181 = vmatprep.subr.bf16.mxu0 %v1898_v35  ;;  %1222 = vmatprep.subr.bf16.mxu1 %v1900_v36 }
 0x420   : > { %1182 = vmatpush1.bf16.msra.mxu0 %v1902_v37  ;;  %1223 = vmatpush1.bf16.msra.mxu1 %v1903_v38 }
 0x423   : > { %1200 = vmatmul.mubr.bf16.vlgmr.msra.gmra.mrb[0].mxu0 %v2361_v16  ;;  %1241 = vmatmul.mubr.bf16.vlgmr.msra.gmra.mrb[0].mxu1 %v2361_v16  ;;  %v987_v16 = vlaneseq }
 0x425   : > { %v988_v55 = vshrl.u32 %v987_v16, 7 }
 0x427   : > { %v989_v56 = vsub.s32 0, %v988_v55  ;;  %v997_v57 = vsub.s32 2, %v988_v55  ;;  %v993_v59 = vsub.s32 1, %v988_v55  ;;  %v1001_v60 = vsub.s32 3, %v988_v55 }
 0x429   : > { %v990_v61 = vrot.slane %v985_v58, %v989_v56  ;;  %v998_v62 = vrot.slane %v985_v58, %v997_v57  ;;  %v994_v63 = vrot.slane %v985_v58, %v993_v59  ;;  %v1002_v0 = vrot.slane %v985_v58, %v1001_v60 }
 0x489   : > { %v926_v42 = vpop.permute.xlu0 %925  ;;  %v947_v49 = vpop.permute.xlu1 %946 }
 0x48a   : > { %v928_v43 = vsub.f32 %v917_v40, %v926_v42  ;;  %v929_v44 = vsub.f32 %v918_v41, %v926_v42 }
 0x48c   : > { %v930_v45 = vmul.f32 1.442695, %v928_v43  ;;  %v932_v46 = vmul.f32 1.442695, %v929_v44 }
 0x48e   : > { %1906 = vpow2.f32 %v930_v45 }
 0x48f   : > { %1908 = vpow2.f32 %v932_v46 }
 0x495   : > { %v937_v47 = vpop.permute.xlu0 %936 }
 0x498   : > { %v1907_v48 = vpop.eup %1906 }
 0x499   : > { %v1909_v50 = vpop.eup %1908  ;;  %v939_v51 = vmul.f32 %v1907_v48, %v937_v47 }
 0x49a   : > { %v940_v52 = vmul.f32 %v1909_v50, %v937_v47 }
 0x49b   : > { %941 = vst [vmem:[#allocation13] sm:$0xff] %v939_v51  ;;  %v949_v53 = vmul.f32 %v947_v49, %v939_v51 }
 0x49c   : > { %942 = vst [vmem:[#allocation13 + $0x8] sm:$0xff] %v940_v52  ;;  %v950_v54 = vmul.f32 %v947_v49, %v940_v52 }
 0x49d   : > { %951 = vst [vmem:[#allocation14] sm:$0xff] %v949_v53 }
 0x49e   : > { %952 = vst [vmem:[#allocation14 + $0x8] sm:$0xff] %v950_v54 }
 0x4f6   : > { %v1201_v1 = vpop.f32.mrb[0].mxu0  ;;  %v1242_v2 = vpop.f32.mrb[0].mxu1 }
 0x4f7   : > { %v1202_v3 = vadd.f32 %v1201_v1, %v990_v61  ;;  %v1243_v4 = vadd.f32 %v1242_v2, %v998_v62  ;;  %v1203_v5 = vpop.f32.mrb[1].mxu0  ;;  %v1244_v6 = vpop.f32.mrb[1].mxu1 }
 0x4f8   : > { %v1204_v7 = vadd.f32 %v1203_v5, %v994_v63  ;;  %v1245_v8 = vadd.f32 %v1244_v6, %v1002_v0  ;;  %v1205_v9 = vpop.f32.mrb[2].mxu0  ;;  %v1246_v10 = vpop.f32.mrb[2].mxu1 }
 0x4f9   : > { %1249 = vst [vmem:[#allocation17] sm:$0xff] %v1202_v3  ;;  %1251 = vst [vmem:[#allocation16] sm:$0xff] %v1243_v4  ;;  %v1206_v11 = vpop.f32.mrb[3].mxu0  ;;  %v1247_v12 = vpop.f32.mrb[3].mxu1 }
 0x4fa   : > { %1250 = vst [vmem:[#allocation17 + $0x8] sm:$0xff] %v1204_v7  ;;  %1252 = vst [vmem:[#allocation16 + $0x8] sm:$0xff] %v1245_v8 }
 0x4fb PF: > { %p1769_p2 = scmp.eq.s32.totalorder %s2270_s27, 1  ;;  %s2156_s21 = smov [#allocation14]  }
 0x4fc   : > { %s1303_s4 = sshll.u32 %s2156_s21, 4  ;;  %s2157_s18 = smov [#allocation13]   ;;  %s1304_s4 = int_to_ptr.vmem [resolvable:$true] %s1303_s4 }
 0x4fd   : > { %s1286_s28 = sshll.u32 %s2157_s18, 4  ;;  %s2379_s12 = scalar_lea.sflag [#allocation15], %s516_s16  ;;  %s1287_s28 = int_to_ptr.vmem [resolvable:$true] %s1286_s28 }
 0x4fe   : > { %s1994_s15 = scalar_lea.vmem %s1304_s4, 256  ;;  %s2000_s23 = scalar_lea.vmem %s1304_s4, 512 }
 0x4ff   : > { %p1995_p4 = scmp.ne.s32.totalorder %s1304_s4, %s1994_s15  ;;  %p2001_p9 = scmp.lt.s32.totalorder %s1304_s4, %s1304_s4 }
 0x500   : > { %p2002_p11 = scmp.lt.s32.totalorder %s2000_s23, %s1994_s15 }
 0x501   : > { %p1996_p0 = pnand %p1995_p4, %p1769_p2 }
 0x502   : > { %p2003_p7 = por %p2002_p11, %p2001_p9 }
 0x503   : > { %p1997_p6 = pneg %p1996_p0 }
 0x505   : > { %p2004_p3 = pnand %p2003_p7, %p1997_p6 }
 0x507   : > { %2007 = shalt.err (!%p2004_p3)
}
 0x508   : > { %s2008_s29 = scalar_lea.hbm %s2479_s9, 256 }
 0x509   : > { %p2009_p8 = scmp.ne.s32.totalorder %s2479_s9, %s2008_s29  ;;  %p2014_p5 = scmp.lt.u32.totalorder %s2008_s29, %s2479_s9 }
 0x50b   : > { %p2010_p12 = pnand %p2009_p8, %p1769_p2 }
 0x50d   : > { %p2011_p13 = pneg %p2010_p12 }
 0x50f   : > { %p2016_p10 = pnand %p2014_p5, %p2011_p13 }
 0x511   : > { %2019 = shalt.err (!%p2016_p10)
}
 0x512   : > { %1725 = dma.vmem_to_hbm [thread:$0]  (%p1769_p2), %s1304_s4, 256, %s2479_s9, %s2379_s12  }
 0x513   : > { %s2020_s17 = scalar_lea.vmem %s1287_s28, 256  ;;  %s2026_s13 = scalar_lea.vmem %s1287_s28, 512 }
 0x514   : > { %p2021_p1 = scmp.ne.s32.totalorder %s1287_s28, %s2020_s17  ;;  %p2027_p6 = scmp.lt.s32.totalorder %s1287_s28, %s1287_s28 }
 0x515   : > { %p2028_p9 = scmp.lt.s32.totalorder %s2026_s13, %s2020_s17 }
 0x516   : > { %p2022_p4 = pnand %p2021_p1, %p1769_p2 }
 0x517   : > { %p2029_p11 = por %p2028_p9, %p2027_p6 }
 0x518   : > { %p2023_p0 = pneg %p2022_p4 }
 0x51a   : > { %p2030_p7 = pnand %p2029_p11, %p2023_p0 }
 0x51c   : > { %2033 = shalt.err (!%p2030_p7)
}
 0x51d   : > { %s2034_s15 = scalar_lea.hbm %s2478_s8, 256 }
 0x51e   : > { %p2035_p3 = scmp.ne.s32.totalorder %s2478_s8, %s2034_s15  ;;  %p2040_p13 = scmp.lt.u32.totalorder %s2034_s15, %s2478_s8 }
 0x520   : > { %p2036_p8 = pnand %p2035_p3, %p1769_p2 }
 0x522   : > { %p2037_p12 = pneg %p2036_p8 }
 0x524   : > { %p2042_p5 = pnand %p2040_p13, %p2037_p12 }
 0x526   : > { %2045 = shalt.err (!%p2042_p5)
}
 0x527   : > { %1723 = dma.vmem_to_hbm [thread:$0]  (%p1769_p2), %s1287_s28, 256, %s2478_s8, [#allocation9]  }
 0x528   : > { %s2158_s26 = smov [#allocation16]   ;;  %s2159_s22 = smov [#allocation17]  }
 0x529   : > { %s1320_s16 = sshll.u32 %s2158_s26, 4  ;;  %s1337_s20 = sshll.u32 %s2159_s22, 4  ;;  %s1321_s16 = int_to_ptr.vmem [resolvable:$true] %s1320_s16  ;;  %s1338_s20 = int_to_ptr.vmem [resolvable:$true] %s1337_s20 }
 0x52a   : > { %s2046_s30 = scalar_lea.vmem %s1321_s16, 256  ;;  %s2052_s17 = scalar_lea.vmem %s1321_s16, 512 }
 0x52b   : > { %p2047_p10 = scmp.ne.s32.totalorder %s1321_s16, %s2046_s30  ;;  %p2053_p0 = scmp.lt.s32.totalorder %s1321_s16, %s1321_s16 }
 0x52c   : > { %p2054_p6 = scmp.lt.s32.totalorder %s2052_s17, %s2046_s30 }
 0x52d   : > { %p2048_p1 = pnand %p2047_p10, %p1769_p2 }
 0x52e   : > { %p2055_p9 = por %p2054_p6, %p2053_p0 }
 0x52f   : > { %p2049_p4 = pneg %p2048_p1 }
 0x531   : > { %p2056_p11 = pnand %p2055_p9, %p2049_p4 }
 0x533   : > { %2059 = shalt.err (!%p2056_p11)
}
 0x534   : > { %s2060_s28 = scalar_lea.hbm %s2480_s10, 256 }
 0x535   : > { %p2061_p7 = scmp.ne.s32.totalorder %s2480_s10, %s2060_s28  ;;  %p2066_p12 = scmp.lt.u32.totalorder %s2060_s28, %s2480_s10 }
 0x537   : > { %p2062_p3 = pnand %p2061_p7, %p1769_p2 }
 0x539   : > { %p2063_p8 = pneg %p2062_p3 }
 0x53b   : > { %p2068_p13 = pnand %p2066_p12, %p2063_p8 }
 0x53d   : > { %2071 = shalt.err (!%p2068_p13)
}
 0x53e   : > { %1727 = dma.vmem_to_hbm [thread:$0]  (%p1769_p2), %s1321_s16, 256, %s2480_s10, %s2379_s12  }
 0x53f   : > { %s2072_s29 = scalar_lea.vmem %s1338_s20, 256  ;;  %s2078_s14 = scalar_lea.vmem %s1338_s20, 512 }
 0x540   : > { %p2073_p5 = scmp.ne.s32.totalorder %s1338_s20, %s2072_s29  ;;  %p2079_p4 = scmp.lt.s32.totalorder %s1338_s20, %s1338_s20 }
 0x541   : > { %p2080_p0 = scmp.lt.s32.totalorder %s2078_s14, %s2072_s29 }
 0x542   : > { %p2074_p10 = pnand %p2073_p5, %p1769_p2 }
 0x543   : > { %p2081_p6 = por %p2080_p0, %p2079_p4 }
 0x544   : > { %p2075_p1 = pneg %p2074_p10 }
 0x546   : > { %p2082_p9 = pnand %p2081_p6, %p2075_p1 }
 0x548   : > { %2085 = shalt.err (!%p2082_p9)
}
 0x549   : > { %s2086_s30 = scalar_lea.hbm %s2481_s11, 256 }
 0x54a   : > { %p2087_p11 = scmp.ne.s32.totalorder %s2481_s11, %s2086_s30  ;;  %p2092_p8 = scmp.lt.u32.totalorder %s2086_s30, %s2481_s11 }
 0x54c   : > { %p2088_p7 = pnand %p2087_p11, %p1769_p2 }
 0x54e   : > { %p2089_p3 = pneg %p2088_p7 }
 0x550   : > { %p2094_p12 = pnand %p2092_p8, %p2089_p3 }
 0x552   : > { %2097 = shalt.err (!%p2094_p12)
}
 0x553   : > { %1729 = dma.vmem_to_hbm [thread:$0]  (%p1769_p2), %s1338_s20, 256, %s2481_s11, [#allocation18]  }
 0x554 PF: > { %s2503_s18 = sadd.s32 4294967294, %s2140_s19   ;;  %p2504_p5 = scmp.ge.s32.totalorder %s2140_s19, 2 }
 0x555   : > { %p1774_p13 = scmp.eq.s32.totalorder %s2503_s18, 1 }
 0x557   : > { %p1750_p10 = pnand %p1774_p13, %p2504_p5 }
 0x559   : > { %2119 = dma.done.wait (!%p1750_p10), [#allocation9], 256  }
 0x55a   : > { %2121 = vsyncadd (!%p1750_p10), [#allocation9], 4294967040  ;;  %s2505_s15 = smov %s2503_s18 }
 0x55b   : > { %s1358_s23 = sand.u32 1, %s2505_s15  }
 0x55c   : > { %s1359_s24 = scalar_lea.sflag [#allocation15], %s1358_s23 }
 0x55d   : > { %2123 = dma.done.wait (!%p1750_p10), %s1359_s24, 512  }
 0x55e   : > { %2125 = vsyncadd (!%p1750_p10), %s1359_s24, 4294966784 }
 0x55f   : > { %2127 = dma.done.wait (!%p1750_p10), [#allocation18], 256  }
 0x560   : > { %2129 = vsyncadd (!%p1750_p10), [#allocation18], 4294967040  ;;  %s35_s19 = sadd.s32 1, %s2140_s19   ;;  %s2506_s17 = sld [smem:[#allocation24_spill]] }
 0x561   : > { %p32_p2 = scmp.ge.s32.totalorder %s35_s19, 4   ;;  %s2507_s18 = sld [smem:[#allocation25_spill]] }
 0x563   :  { %34 = sbr.rel (!%p32_p2) target bundleno = 12 (0xc), region = 191 }
 0x56a   :  { %1382 = vsyncpa [#allocation8], 1 }
 0x56b   :  { %1384 = vsyncpa [#allocation8 + $0x1], 1 }
 0x56c   :  { %1385 = vsyncpa [#allocation11], 1 }
 0x56d   :  { %1387 = vsyncpa [#allocation11 + $0x1], 1 }
 0x56e   :  { %1388 = vsyncpa [#allocation9], 1 }
 0x56f   :  { %1390 = vsyncpa [#allocation9 + $0x1], 1 }
 0x570   :  { %1391 = vsyncpa [#allocation15], 1 }
 0x571   :  { %1393 = vsyncpa [#allocation15 + $0x1], 1 }
 0x572   :  { %1394 = vsyncpa [#allocation18], 1 }
 0x573   :  { %1396 = vsyncpa [#allocation18 + $0x1], 1 }

</bundles_post_ra>
